<compile_context>
chip_gen: v7x
topology: tpu7x:2x2x1
jax: 0.10.0
libtpu: 0.0.40
codegen_flags: <defaults>
</compile_context>

<pallas_src>
import functools

import jax
import jax.numpy as jnp
from jax.experimental import pallas as pl
from jax.experimental.pallas import tpu as pltpu


_SUBLANE_PACK = 16     # multiple of both f32 (8) and bf16 (16) sublane packing
_MAX_ROW_TILE = 512    # measured HBM-roofline knee; bigger adds ~1%


def _round_up(x, m):
    return -(-x // m) * m


def _vmem_capacity_bytes():
    """Physical VMEM per core; conservative fallback if the query fails."""
    try:
        return int(pltpu.get_tpu_info().vmem_capacity_bytes)
    except Exception:
        return 64 << 20  # v7x-sized fallback: safe on every generation


def _pick_row_tile(rows, hidden, in_bytes, out_bytes, buffer_budget_bytes):
    """Largest row tile that fits VMEM, shaped for even multi-step grids."""
    # Per-row VMEM: double-buffered input + output tiles, PLUS the in-kernel
    # f32 working set Mosaic keeps in internal scratch (the x.astype(f32)
    # copy and the normalized f32 temp -> ~8 B/elem).
    f32_work_bytes = 8
    per_row_bytes = hidden * (2 * in_bytes + 2 * out_bytes + f32_work_bytes)
    fit = buffer_budget_bytes // max(per_row_bytes, 1)
    row_tile = max(_SUBLANE_PACK, (fit // _SUBLANE_PACK) * _SUBLANE_PACK)
    row_tile = min(row_tile, _MAX_ROW_TILE)

    rows_padded = _round_up(rows, _SUBLANE_PACK)
    max_steps = rows_padded // _SUBLANE_PACK

    # Target an even number of grid steps (>=8 when rows allow, else >=4/2):
    # with dimension_semantics=("parallel",) the single grid axis is sharded
    # across v7x's two TensorCores, so each core should get several tiles to
    # hide prologue DMA / epilogue writeback.
    for target_steps in (8, 6, 4, 2):
        if max_steps >= target_steps:
            cap = _round_up(pl.cdiv(rows, target_steps), _SUBLANE_PACK)
            row_tile = min(row_tile, max(_SUBLANE_PACK, cap))
            break
    row_tile = min(row_tile, rows_padded)

    # Nudge the tile down until the step count is even (so the parallel axis
    # splits evenly across two cores); bottoms out at one sublane-pack.
    while row_tile > _SUBLANE_PACK and (pl.cdiv(rows, row_tile) % 2) == 1:
        row_tile -= _SUBLANE_PACK

    return max(_SUBLANE_PACK, row_tile)


def _rmsnorm_kernel(x_ref, w_ref, o_ref, *, eps):
    # x_ref: (row_tile, hidden), w_ref: (1, hidden)
    input_dtype = x_ref.dtype
    x = x_ref[...].astype(jnp.float32)                      # .to(float32)
    variance = jnp.mean(x * x, axis=-1, keepdims=True)      # pow(2).mean(-1)
    normed = x * jax.lax.rsqrt(variance + eps)              # x * rsqrt(var+eps)
    # weight * hidden_states.to(input_dtype)  (promotes exactly like torch;
    # the (1,hidden) weight broadcast fuses into this multiply).
    out = w_ref[...] * normed.astype(input_dtype)
    o_ref[...] = out.astype(o_ref.dtype)
    # TODO(synk): on v7x (bf16 I/O @ 3.2 TB/s HBM) the cast-heavy VALU path
    # can become the binding slot; a bf16-square/f32-accumulate variant would
    # deviate slightly from torch's f32 math, so it is not applied here.


def rmsnorm(hidden_states, weight, eps=1e-6, *, row_tile=None,
            cast_weight_to_input_dtype=False):
    """Pallas RMSNorm.  hidden_states: (..., hidden), weight: (hidden,).

    cast_weight_to_input_dtype=True is an opt-in fast path that pre-casts the
    weight to the activation dtype so the output stays e.g. bf16 (deviates
    from torch's bf16*f32->f32 promotion but cuts writeback bytes ~33%).
    """
    orig_shape = hidden_states.shape
    hidden = orig_shape[-1]
    x2d = hidden_states.reshape(-1, hidden)
    rows = x2d.shape[0]

    if cast_weight_to_input_dtype:
        w2d = weight.astype(hidden_states.dtype).reshape(1, hidden)
        out_dtype = hidden_states.dtype
    else:
        w2d = weight.reshape(1, hidden)
        # Output dtype follows torch promotion: weight * x(input_dtype)
        out_dtype = jnp.promote_types(weight.dtype, hidden_states.dtype)

    in_bytes = jnp.dtype(x2d.dtype).itemsize
    out_bytes = jnp.dtype(out_dtype).itemsize
    w_bytes = jnp.dtype(w2d.dtype).itemsize

    # VMEM budgeting: raise the scoped limit (default is only 16 MiB on v5e)
    # but cap it near 64 MiB -- 512-row tiles already hit the bandwidth knee,
    # and grabbing more scoped VMEM only starves co-scheduled XLA fusions.
    capacity = _vmem_capacity_bytes()
    vmem_limit = min(int(capacity * 3 // 4), 64 << 20)
    buffer_budget = int(vmem_limit * 0.75)

    if row_tile is None:
        row_tile = _pick_row_tile(rows, hidden, in_bytes, out_bytes,
                                  buffer_budget)
    row_tile = max(_SUBLANE_PACK, _round_up(row_tile, _SUBLANE_PACK))

    grid = (pl.cdiv(rows, row_tile),)

    cost = pl.CostEstimate(
        flops=4 * rows * hidden,
        transcendentals=rows,
        bytes_accessed=rows * hidden * (in_bytes + out_bytes) + hidden * w_bytes,
    )

    kernel = functools.partial(_rmsnorm_kernel, eps=eps)
    out = pl.pallas_call(
        kernel,
        out_shape=jax.ShapeDtypeStruct((rows, hidden), out_dtype),
        grid_spec=pltpu.PrefetchScalarGridSpec(
            num_scalar_prefetch=0,
            grid=grid,
            in_specs=[
                pl.BlockSpec((row_tile, hidden), lambda i: (i, 0)),
                pl.BlockSpec((1, hidden), lambda i: (0, 0)),  # grid-invariant
            ],
            out_specs=pl.BlockSpec((row_tile, hidden), lambda i: (i, 0)),
        ),
        compiler_params=pltpu.CompilerParams(
            dimension_semantics=("parallel",),
            vmem_limit_bytes=vmem_limit,
        ),
        cost_estimate=cost,
    )(x2d, w2d)

    return out.reshape(orig_shape[:-1] + (hidden,))


def rmsnorm_reference(hidden_states, weight, eps=1e-6):
    """Pure-JAX reference mirroring the PyTorch module exactly."""
    input_dtype = hidden_states.dtype
    x = hidden_states.astype(jnp.float32)
    variance = jnp.mean(x * x, axis=-1, keepdims=True)
    x = x * jax.lax.rsqrt(variance + eps)
    return weight * x.astype(input_dtype)


if __name__ == "__main__":
    key = jax.random.PRNGKey(0)
    batch, seq, hidden = 2, 8, 128

    x = jax.random.normal(key, (batch, seq, hidden), dtype=jnp.float32)
    # Deterministic parameter init (module initializes weight to ones).
    weight = jnp.ones((hidden,), dtype=jnp.float32)

    # Exact torch-semantics path (f32 activations).
    out = rmsnorm(x, weight, eps=1e-6)
    out = jax.block_until_ready(out)

    ref = rmsnorm_reference(x, weight, eps=1e-6)
    assert out.shape == ref.shape, (out.shape, ref.shape)
    assert out.dtype == ref.dtype, (out.dtype, ref.dtype)
    assert jnp.allclose(out, ref, atol=1e-5, rtol=1e-5), "mismatch vs reference"

    # bf16 fast path (weight pre-cast to input dtype -> bf16 output).
    x_bf16 = x.astype(jnp.bfloat16)
    out_bf16 = rmsnorm(x_bf16, weight, eps=1e-6,
                       cast_weight_to_input_dtype=True)
    out_bf16 = jax.block_until_ready(out_bf16)
    ref_bf16 = rmsnorm_reference(x_bf16, weight.astype(jnp.bfloat16), eps=1e-6)
    assert out_bf16.shape == ref_bf16.shape
    assert out_bf16.dtype == jnp.bfloat16, out_bf16.dtype
    assert jnp.allclose(out_bf16.astype(jnp.float32),
                        ref_bf16.astype(jnp.float32),
                        atol=2e-2, rtol=2e-2), "mismatch vs bf16 reference"

    print("KERNEL_OK")
</pallas_src>

<mosaic_0001>
module attributes {stable_mosaic.version = 11 : i64} {
  func.func @_rmsnorm_kernel(%arg0: i32, %arg1: memref<16x128xf32, #tpu.memory_space<vmem>>, %arg2: memref<1x128xf32, #tpu.memory_space<vmem>>, %arg3: memref<16x128xf32, #tpu.memory_space<vmem>>) attributes {dimension_semantics = [#tpu.dimension_semantics<parallel>], iteration_bounds = array<i64: 1>, scalar_prefetch = 0 : i64, scratch_operands = 0 : i64, tpu.core_type = #tpu.core_type<tc>, window_params = [{transform_indices = @transform_0, window_bounds = array<i64: 16, 128>}, {pipeline_mode = #tpu.pipeline_mode<synchronous>, transform_indices = @transform_1, window_bounds = array<i64: 1, 128>}, {transform_indices = @transform_2, window_bounds = array<i64: 16, 128>}]} {
    %c0 = arith.constant 0 : index
    %c0_0 = arith.constant 0 : index
    %0 = vector.load %arg1[%c0, %c0_0] : memref<16x128xf32, #tpu.memory_space<vmem>>, vector<16x128xf32>
    %1 = arith.mulf %0, %0 : vector<16x128xf32>
    %cst = arith.constant dense<0.000000e+00> : vector<16xf32>
    %2 = vector.multi_reduction <add>, %1, %cst [1] : vector<16x128xf32> to vector<16xf32>
    %3 = vector.shape_cast %2 : vector<16xf32> to vector<16x1xf32>
    %cst_1 = arith.constant 1.280000e+02 : f32
    %4 = vector.broadcast %cst_1 : f32 to vector<16x1xf32>
    %5 = arith.divf %3, %4 : vector<16x1xf32>
    %cst_2 = arith.constant 9.99999997E-7 : f32
    %6 = vector.broadcast %cst_2 : f32 to vector<16x1xf32>
    %7 = arith.addf %5, %6 : vector<16x1xf32>
    %8 = math.rsqrt %7 : vector<16x1xf32>
    %9 = vector.broadcast %8 : vector<16x1xf32> to vector<16x128xf32>
    %10 = arith.mulf %0, %9 : vector<16x128xf32>
    %c0_3 = arith.constant 0 : index
    %c0_4 = arith.constant 0 : index
    %11 = vector.load %arg2[%c0_3, %c0_4] : memref<1x128xf32, #tpu.memory_space<vmem>>, vector<1x128xf32>
    %12 = vector.broadcast %11 : vector<1x128xf32> to vector<16x128xf32>
    %13 = arith.mulf %12, %10 : vector<16x128xf32>
    %c0_5 = arith.constant 0 : index
    %c0_6 = arith.constant 0 : index
    %14 = vector.load %arg3[%c0_5, %c0_6] : memref<16x128xf32, #tpu.memory_space<vmem>>, vector<16x128xf32>
    tpu.vector_store %arg3[%c0_5, %c0_6], %13 {strides = array<i32>} : memref<16x128xf32, #tpu.memory_space<vmem>>, vector<16x128xf32>,
    return
  }
  func.func @transform_0(%arg0: i32) -> (i32, i32) {
    %c0_i32 = arith.constant 0 : i32
    %c0_i32_0 = arith.constant 0 : i32
    return %arg0, %c0_i32 : i32, i32
  }
  func.func @transform_1(%arg0: i32) -> (i32, i32) {
    %c0_i32 = arith.constant 0 : i32
    %c0_i32_0 = arith.constant 0 : i32
    %c0_i32_1 = arith.constant 0 : i32
    return %c0_i32, %c0_i32_0 : i32, i32
  }
  func.func @transform_2(%arg0: i32) -> (i32, i32) {
    %c0_i32 = arith.constant 0 : i32
    %c0_i32_0 = arith.constant 0 : i32
    return %arg0, %c0_i32 : i32, i32
  }
}

</mosaic_0001>

<bundles_post_ra>
// kernel: tpu_custom_call.1
= control target key start
LH: loop header
LB: loop body
LE: loop exit
PB: predicated region body
PF: predicated region fallthrough
CT: control target
= control target key end

     0   :  { %7 = vsyncpa [#allocation3], 0  ;;  %s180_s0 = inlined_call_operand.hbm [shape: f32[16,128], index: 0, kind: input, shape index: {}]   ;;  %s181_s1 = inlined_call_operand.vmem [shape: f32[1,128], index: 1, kind: input, shape index: {}]   ;;  %s182_s2 = inlined_call_operand.hbm [shape: f32[16,128], index: 2, kind: output, shape index: {}]  }
   0x1   :  { %8 = vsyncpa [#allocation4], 0  ;;  %s128_s9 = smov [#allocation2]   ;;  %s80_s13 = scalar_lea.hbm %s180_s0, 256 }
   0x2   :  { %s14_s10 = sshll.u32 %s128_s9, 4  ;;  %p81_p0 = scmp.ne.s32.totalorder %s180_s0, %s80_s13  ;;  %s15_s10 = int_to_ptr.vmem [resolvable:$true] %s14_s10 }
   0x3   :  { %p84_p1 = scmp.lt.u32.totalorder %s80_s13, %s180_s0 }
   0x5   :  { %p86_p2 = pnand %p84_p1, %p81_p0 }
   0x7   :  { %89 = shalt.err (!%p86_p2)
}
   0x8   :  { %s90_s18 = scalar_lea.vmem %s15_s10, 256  ;;  %p95_p4 = scmp.lt.s32.totalorder %s15_s10, %s15_s10 }
   0x9   :  { %p91_p3 = scmp.ne.s32.totalorder %s15_s10, %s90_s18  ;;  %p96_p5 = scmp.lt.s32.totalorder %s90_s18, %s90_s18 }
   0xb   :  { %p97_p6 = por %p96_p5, %p95_p4 }
   0xd   :  { %p98_p7 = pnand %p97_p6, %p91_p3 }
   0xf   :  { %101 = shalt.err (!%p98_p7)
}
  0x10   :  { %s129_s19 = smov 128   ;;  %s130_s20 = smov 8  }
  0x11   :  { %20 = dma.hbm_to_vmem [thread:$0]  %s180_s0, 256, %s15_s10, [#allocation3], %s129_s19, %s129_s19, %s130_s20  }
  0x12   :  { %124 = dma.done.wait [#allocation3], 256  }
  0x13   :  { %125 = vsyncadd [#allocation3], 4294967040  ;;  %v26_v0 = vld [vmem:[#allocation2] sm:$0xff]  ;;  %v27_v1 = vld [vmem:[#allocation2 + $0x8] sm:$0xff]  ;;  %s131_s0 = smov [#allocation5]  }
  0x14   :  { %v28_v2 = vmul.f32 %v26_v0, %v26_v0  ;;  %v29_v3 = vmul.f32 %v27_v1, %v27_v1  ;;  %v71_v11 = vld [vmem:[%s181_s1] ss:$0 sm:$0xff]  ;;  %s59_s25 = sshll.u32 %s131_s0, 4  ;;  %s60_s25 = int_to_ptr.vmem [resolvable:$true] %s59_s25 }
  0x15   :  { %s102_s26 = scalar_lea.vmem %s60_s25, 256  ;;  %p107_p9 = scmp.lt.s32.totalorder %s60_s25, %s60_s25 }
  0x16   :  { %30 = vadd.xlane.f32.xlu0 %v28_v2  ;;  %p103_p8 = scmp.ne.s32.totalorder %s60_s25, %s102_s26  ;;  %p108_p10 = scmp.lt.s32.totalorder %s102_s26, %s102_s26 }
  0x18   :  { %p109_p11 = por %p108_p10, %p107_p9 }
  0x1a   :  { %32 = vadd.xlane.f32.xlu0 %v29_v3  ;;  %p110_p12 = pnand %p109_p11, %p103_p8 }
  0xa3   :  { %v31_v4 = vpop.xlane.xlu0 %30 }
  0xa4   :  { %v35_v5 = vmul.f32 0.0078125, %v31_v4 }
  0xa6   :  { %v37_v6 = vadd.f32 1e-06, %v35_v5 }
  0xa7   :  { %v33_v7 = vpop.xlane.xlu0 %32 }
  0xa8   :  { %76 = vrsqrt.f32 %v37_v6  ;;  %v36_v8 = vmul.f32 0.0078125, %v33_v7 }
  0xaa   :  { %v38_v9 = vadd.f32 1e-06, %v36_v8 }
  0xac   :  { %78 = vrsqrt.f32 %v38_v9 }
  0xb2   :  { %v77_v10 = vpop.eup %76 }
  0xb3   :  { %v41_v12 = vmul.f32 %v77_v10, %v26_v0 }
  0xb5   :  { %v50_v13 = vmul.f32 %v71_v11, %v41_v12 }
  0xb6   :  { %v79_v14 = vpop.eup %78 }
  0xb7   :  { %v42_v15 = vmul.f32 %v79_v14, %v27_v1  ;;  %52 = vst [vmem:[#allocation5] sm:$0xff] %v50_v13 }
  0xb9   :  { %v51_v16 = vmul.f32 %v71_v11, %v42_v15 }
  0xbb   :  { %53 = vst [vmem:[#allocation5 + $0x8] sm:$0xff] %v51_v16 }
  0xbc   :  { %113 = shalt.err (!%p110_p12)
}
  0xbd   :  { %s114_s1 = scalar_lea.hbm %s182_s2, 256 }
  0xbe   :  { %p115_p13 = scmp.ne.s32.totalorder %s182_s2, %s114_s1  ;;  %p118_p0 = scmp.lt.u32.totalorder %s114_s1, %s182_s2 }
  0xc0   :  { %p120_p1 = pnand %p118_p0, %p115_p13 }
  0xc2   :  { %123 = shalt.err (!%p120_p1)
}
  0xc3   :  { %65 = dma.vmem_to_hbm [thread:$0]  %s60_s25, 256, %s182_s2, [#allocation4], %s129_s19, %s129_s19, %s130_s20  }
  0xc4   :  { %126 = dma.done.wait [#allocation4], 256  }
  0xc5   :  { %127 = vsyncadd [#allocation4], 4294967040 }
  0xc6   :  { %69 = vsyncpa [#allocation3], 1 }
  0xc7   :  { %70 = vsyncpa [#allocation4], 1 }

</bundles_post_ra>
